<compile_context>
chip_gen: v5e
topology: v5e:2x2
jax: 0.10.0
libtpu: 0.0.40
codegen_flags: <defaults>
</compile_context>

<pallas_src>
import jax
import jax.numpy as jnp
from jax.experimental import pallas as pl
from jax.experimental.pallas import tpu as pltpu


# ---------------------------------------------------------------------------
# Fused kernel for ONE block of Bt sentence pairs:
#   1) xproj = X @ [w_ioux|w_fx] + (bx + bh)          (one matmul, all tokens)
#   2) batched (M = 2*Bt rows) ChildSum recurrence over seq steps
#   3) backward hiddens = zero-state node_forward on the last token
#      (== xproj slice, since bh is already folded in and h=0, c=0)
#   4) Similarity head: sigmoid(wh(vec_dist)) -> log_softmax(wp(.))
# ---------------------------------------------------------------------------
def fused_kernel(x_ref, wx_ref, bxh_ref, wh_ref,
                 whw_ref, whb_ref, wpw_ref, wpb_ref,
                 out_ref, xproj_scr, vd_scr):
    rows = x_ref.shape[0]               # seq * 2 * Bt
    mem = wh_ref.shape[0]
    bt = out_ref.shape[0]               # pairs in this block
    step = 2 * bt                       # rows per timestep: [lefts | rights]
    seq = rows // step

    # Hoist recurrent weights into vregs once (mem x 4*mem = 16 KiB at mem=32).
    wh = wh_ref[...]                                     # (mem, 4*mem)

    # (1) hoisted input projections for every (timestep, pair, side).
    #     biases bx AND bh are pre-folded on the host, so no per-step bias add.
    xproj_scr[...] = (jnp.dot(x_ref[...], wx_ref[...],
                              preferred_element_type=jnp.float32)
                      + bxh_ref[...])                    # (rows, 4*mem)

    def combine(gates, c_prev):
        # Full-slab nonlinearities: 2 EUP passes over all 4 gate blocks.
        sg = jax.nn.sigmoid(gates)                       # (step, 4*mem)
        tg = jnp.tanh(gates)                             # (step, 4*mem)
        i_g = sg[:, 0 * mem:1 * mem]
        o_g = sg[:, 1 * mem:2 * mem]
        u_g = tg[:, 2 * mem:3 * mem]
        f_g = sg[:, 3 * mem:4 * mem]
        c_new = i_g * u_g + f_g * c_prev                 # single child -> sum(fc)==fc
        h_new = o_g * jnp.tanh(c_new)
        return c_new, h_new

    # (2) forward recurrence, all pairs & both sides batched in M.
    c = jnp.zeros((step, mem), jnp.float32)
    h = jnp.zeros((step, mem), jnp.float32)
    for t in range(seq):                                 # static -> fully unrolled
        gates = (xproj_scr[t * step:(t + 1) * step, :]
                 + jnp.dot(h, wh, preferred_element_type=jnp.float32))
        c, h = combine(gates, c)
    # h rows: [0:bt] = left forward hiddens, [bt:2bt] = right forward hiddens.

    # (3) backward hidden = node_forward(last token, c=0, h=0):
    #     h=0 => h@wh == 0 and bh is already inside xproj -> pure slice.
    gates_b = xproj_scr[(seq - 1) * step:seq * step, :]
    _, h_b = combine(gates_b, jnp.zeros((step, mem), jnp.float32))

    # (4) similarity head, kept entirely in vregs except the lane-packed vec_dist.
    hf_l = h[0:bt, :]
    hf_r = h[bt:2 * bt, :]
    hb_l = h_b[0:bt, :]
    hb_r = h_b[bt:2 * bt, :]

    # vec_dist (torch order): [ lf*rf | lb*rb | |lf-rf| | |lb-rb| ]  -> (bt, 4*mem)
    vd_scr[:, 0 * mem:1 * mem] = hf_l * hf_r
    vd_scr[:, 1 * mem:2 * mem] = hb_l * hb_r
    vd_scr[:, 2 * mem:3 * mem] = jnp.abs(hf_l - hf_r)
    vd_scr[:, 3 * mem:4 * mem] = jnp.abs(hb_l - hb_r)

    hid = jax.nn.sigmoid(
        jnp.dot(vd_scr[...], whw_ref[...], preferred_element_type=jnp.float32)
        + whb_ref[...])                                  # (bt, hidden)

    logits = (jnp.dot(hid, wpw_ref[...], preferred_element_type=jnp.float32)
              + wpb_ref[...])                            # (bt, num_classes)

    # stable log_softmax over the class dimension
    m_max = jnp.max(logits, axis=-1, keepdims=True)
    shifted = logits - m_max
    lse = jnp.log(jnp.sum(jnp.exp(shifted), axis=-1, keepdims=True))
    out_ref[...] = shifted - lse


# ---------------------------------------------------------------------------
# Batched forward: B sentence pairs, tiled into blocks of `block_pairs` pairs
# over a "parallel" grid axis (v7x: second TensorCore; all gens: launch amortize).
# ---------------------------------------------------------------------------
def similarity_treelstm_forward_batched(linputs, rinputs, params, *, block_pairs=None):
    lemb = params["emb"][linputs]                        # (B, seq, in_dim)
    remb = params["emb"][rinputs]
    B, seq, in_dim = lemb.shape
    mem = params["wh"].shape[0]
    num_classes = params["wp_w"].shape[1]

    bt = B if block_pairs is None else block_pairs
    assert B % bt == 0
    nb = B // bt
    rows = seq * 2 * bt

    # x[b, t*2*bt + s*bt + j, :] = embedding of pair (b*bt + j), side s (0=L,1=R), time t
    xs = jnp.stack([lemb, remb], axis=1)                 # (B, 2, seq, in)
    xs = xs.reshape(nb, bt, 2, seq, in_dim)
    xs = xs.transpose(0, 3, 2, 1, 4)                     # (nb, seq, 2, bt, in)
    x = xs.reshape(nb, rows, in_dim)

    def full_spec(shape):
        return pl.BlockSpec(shape, lambda b: (0,) * len(shape))

    out = pl.pallas_call(
        fused_kernel,
        out_shape=jax.ShapeDtypeStruct((nb, bt, num_classes), jnp.float32),
        grid=(nb,),
        in_specs=[
            pl.BlockSpec((None, rows, in_dim), lambda b: (b, 0, 0)),   # x block
            full_spec(params["wx"].shape),
            full_spec(params["bxh"].shape),
            full_spec(params["wh"].shape),
            full_spec(params["wh_w"].shape),
            full_spec(params["wh_b"].shape),
            full_spec(params["wp_w"].shape),
            full_spec(params["wp_b"].shape),
        ],
        out_specs=pl.BlockSpec((None, bt, num_classes), lambda b: (b, 0, 0)),
        scratch_shapes=[pltpu.VMEM((rows, 4 * mem), jnp.float32),      # xproj
                        pltpu.VMEM((bt, 4 * mem), jnp.float32)],       # vec_dist
        compiler_params=pltpu.CompilerParams(
            dimension_semantics=("parallel",)),
    )(x, params["wx"], params["bxh"], params["wh"],
      params["wh_w"], params["wh_b"], params["wp_w"], params["wp_b"])

    return out.reshape(B, num_classes)


# Module-semantics forward: one (left, right) pair -> (1, num_classes) log-probs.
def similarity_treelstm_forward(linputs, rinputs, params):
    return similarity_treelstm_forward_batched(linputs[None], rinputs[None], params)


# ---------------------------------------------------------------------------
# Deterministic synthetic parameters (shapes from the module __init__), packed
# into the fused [i|o|u|f] gate layout with bh folded into the projection bias.
# ---------------------------------------------------------------------------
def init_params(key, vocab_size, in_dim, mem_dim, hidden_dim, num_classes):
    keys = jax.random.split(key, 8)

    def linear(k, fan_in, fan_out):
        kw, kb = jax.random.split(k)
        w = jax.random.normal(kw, (fan_out, fan_in), jnp.float32) * 0.1  # torch (out,in)
        b = jax.random.normal(kb, (fan_out,), jnp.float32) * 0.1
        return w.T, b.reshape(1, fan_out)               # kernel layout (in,out), (1,out)

    emb = jax.random.normal(keys[0], (vocab_size, in_dim), jnp.float32) * 0.1
    emb = emb.at[0].set(0.0)                            # padding_idx = Constants.PAD = 0

    w_ioux, b_ioux = linear(keys[1], in_dim, 3 * mem_dim)
    w_iouh, b_iouh = linear(keys[2], mem_dim, 3 * mem_dim)
    w_fx, b_fx = linear(keys[3], in_dim, mem_dim)
    w_fh, b_fh = linear(keys[4], mem_dim, mem_dim)
    wh_w, wh_b = linear(keys[5], 4 * mem_dim, hidden_dim)
    wp_w, wp_b = linear(keys[6], hidden_dim, num_classes)

    # fuse gate weights: columns [i | o | u | f]  (torch split order + forget gate)
    wx = jnp.concatenate([w_ioux, w_fx], axis=1)        # (in_dim, 4*mem)
    wh = jnp.concatenate([w_iouh, w_fh], axis=1)        # (mem,   4*mem)
    # fold BOTH bias sets (input-side bx AND recurrent-side bh) into one bias:
    bxh = (jnp.concatenate([b_ioux, b_fx], axis=1)
           + jnp.concatenate([b_iouh, b_fh], axis=1))   # (1, 4*mem)

    return dict(emb=emb, wx=wx, bxh=bxh, wh=wh,
                wh_w=wh_w, wh_b=wh_b, wp_w=wp_w, wp_b=wp_b)


# ---------------------------------------------------------------------------
# Pure-JAX reference (same fused params) for a numerical sanity check.
# ---------------------------------------------------------------------------
def reference_forward(linputs, rinputs, params):
    mem = params["wh"].shape[0]
    hp = jax.lax.Precision.HIGHEST

    def node(x, c, h):
        g = (jnp.dot(x, params["wx"], precision=hp) + params["bxh"]
             + jnp.dot(h, params["wh"], precision=hp))
        i = jax.nn.sigmoid(g[:, 0 * mem:1 * mem])
        o = jax.nn.sigmoid(g[:, 1 * mem:2 * mem])
        u = jnp.tanh(g[:, 2 * mem:3 * mem])
        f = jax.nn.sigmoid(g[:, 3 * mem:4 * mem])
        c_new = i * u + f * c
        return c_new, o * jnp.tanh(c_new)

    def run(emb):
        c = jnp.zeros((1, mem), jnp.float32)
        h = jnp.zeros((1, mem), jnp.float32)
        for t in range(emb.shape[0]):
            c, h = node(emb[t:t + 1], c, h)
        _, hb = node(emb[-1:], jnp.zeros((1, mem), jnp.float32),
                     jnp.zeros((1, mem), jnp.float32))   # flipped run, hidden[0]
        return h, hb

    lf, lb = run(params["emb"][linputs])
    rf, rb = run(params["emb"][rinputs])
    lvec = jnp.concatenate([lf, lb], axis=1)
    rvec = jnp.concatenate([rf, rb], axis=1)
    vec = jnp.concatenate([lvec * rvec, jnp.abs(lvec - rvec)], axis=1)
    hid = jax.nn.sigmoid(jnp.dot(vec, params["wh_w"], precision=hp) + params["wh_b"])
    logits = jnp.dot(hid, params["wp_w"], precision=hp) + params["wp_b"]
    return jax.nn.log_softmax(logits, axis=-1)


if __name__ == "__main__":
    vocab_size, in_dim, mem_dim, hidden_dim, num_classes = 50, 32, 32, 32, 5
    seq = 8

    key = jax.random.PRNGKey(0)
    kp, kl, kr, kbl, kbr = jax.random.split(key, 5)
    params = init_params(kp, vocab_size, in_dim, mem_dim, hidden_dim, num_classes)

    # --- single pair (exact module semantics) ---
    linputs = jax.random.randint(kl, (seq,), 1, vocab_size, dtype=jnp.int32)
    rinputs = jax.random.randint(kr, (seq,), 1, vocab_size, dtype=jnp.int32)
    fwd = jax.jit(similarity_treelstm_forward)
    out1 = jax.block_until_ready(fwd(linputs, rinputs, params))
    assert out1.shape == (1, num_classes)
    ref1 = reference_forward(linputs, rinputs, params)
    assert float(jnp.max(jnp.abs(out1 - ref1))) < 2e-3

    # --- batched pairs: grid over pair-blocks ("parallel" -> 2nd TC on v7x) ---
    B = 4
    lB = jax.random.randint(kbl, (B, seq), 1, vocab_size, dtype=jnp.int32)
    rB = jax.random.randint(kbr, (B, seq), 1, vocab_size, dtype=jnp.int32)
    fwdB = jax.jit(lambda l, r, p: similarity_treelstm_forward_batched(
        l, r, p, block_pairs=2))
    outB = jax.block_until_ready(fwdB(lB, rB, params))
    assert outB.shape == (B, num_classes)
    refB = jnp.concatenate(
        [reference_forward(lB[i], rB[i], params) for i in range(B)], axis=0)
    assert float(jnp.max(jnp.abs(outB - refB))) < 2e-3

    print("KERNEL_OK")
</pallas_src>

<mosaic_0001>
module attributes {stable_mosaic.version = 11 : i64} {
  func.func @fused_kernel(%arg0: i32, %arg1: memref<1x16x32xf32, #tpu.memory_space<vmem>>, %arg2: memref<32x128xf32, #tpu.memory_space<vmem>>, %arg3: memref<1x128xf32, #tpu.memory_space<vmem>>, %arg4: memref<32x128xf32, #tpu.memory_space<vmem>>, %arg5: memref<128x32xf32, #tpu.memory_space<vmem>>, %arg6: memref<1x32xf32, #tpu.memory_space<vmem>>, %arg7: memref<32x5xf32, #tpu.memory_space<vmem>>, %arg8: memref<1x5xf32, #tpu.memory_space<vmem>>, %arg9: memref<1x1x5xf32, #tpu.memory_space<vmem>>, %arg10: memref<16x128xf32, #tpu.memory_space<vmem>>, %arg11: memref<1x128xf32, #tpu.memory_space<vmem>>) attributes {dimension_semantics = [#tpu.dimension_semantics<parallel>], iteration_bounds = array<i64: 1>, scalar_prefetch = 0 : i64, scratch_operands = 2 : i64, tpu.core_type = #tpu.core_type<tc>, window_params = [{transform_indices = @transform_0, window_bounds = array<i64: 1, 16, 32>}, {pipeline_mode = #tpu.pipeline_mode<synchronous>, transform_indices = @transform_1, window_bounds = array<i64: 32, 128>}, {pipeline_mode = #tpu.pipeline_mode<synchronous>, transform_indices = @transform_2, window_bounds = array<i64: 1, 128>}, {pipeline_mode = #tpu.pipeline_mode<synchronous>, transform_indices = @transform_3, window_bounds = array<i64: 32, 128>}, {pipeline_mode = #tpu.pipeline_mode<synchronous>, transform_indices = @transform_4, window_bounds = array<i64: 128, 32>}, {pipeline_mode = #tpu.pipeline_mode<synchronous>, transform_indices = @transform_5, window_bounds = array<i64: 1, 32>}, {pipeline_mode = #tpu.pipeline_mode<synchronous>, transform_indices = @transform_6, window_bounds = array<i64: 32, 5>}, {pipeline_mode = #tpu.pipeline_mode<synchronous>, transform_indices = @transform_7, window_bounds = array<i64: 1, 5>}, {transform_indices = @transform_8, window_bounds = array<i64: 1, 1, 5>}]} {
    %c0 = arith.constant 0 : index
    %c0_0 = arith.constant 0 : index
    %0 = vector.load %arg4[%c0, %c0_0] : memref<32x128xf32, #tpu.memory_space<vmem>>, vector<32x128xf32>
    %c0_1 = arith.constant 0 : index
    %c0_2 = arith.constant 0 : index
    %c0_3 = arith.constant 0 : index
    %1 = vector.load %arg1[%c0_1, %c0_2, %c0_3] : memref<1x16x32xf32, #tpu.memory_space<vmem>>, vector<1x16x32xf32>
    %2 = vector.shape_cast %1 : vector<1x16x32xf32> to vector<16x32xf32>
    %c0_4 = arith.constant 0 : index
    %c0_5 = arith.constant 0 : index
    %3 = vector.load %arg2[%c0_4, %c0_5] : memref<32x128xf32, #tpu.memory_space<vmem>>, vector<32x128xf32>
    %cst = arith.constant dense<0.000000e+00> : vector<16x128xf32>
    %4 = tpu.matmul %2, %3, %cst {dimension_numbers = #tpu.dot_dimension_numbers<[1], [0], [0], [1], [0, 0, 1, 1], [], []>} : vector<16x32xf32>, vector<32x128xf32>, vector<16x128xf32> -> vector<16x128xf32>
    %c0_6 = arith.constant 0 : index
    %c0_7 = arith.constant 0 : index
    %5 = vector.load %arg3[%c0_6, %c0_7] : memref<1x128xf32, #tpu.memory_space<vmem>>, vector<1x128xf32>
    %6 = vector.broadcast %5 : vector<1x128xf32> to vector<16x128xf32>
    %7 = arith.addf %4, %6 : vector<16x128xf32>
    %c0_8 = arith.constant 0 : index
    %c0_9 = arith.constant 0 : index
    %8 = vector.load %arg10[%c0_8, %c0_9] : memref<16x128xf32, #tpu.memory_space<vmem>>, vector<16x128xf32>
    tpu.vector_store %arg10[%c0_8, %c0_9], %7 {strides = array<i32>} : memref<16x128xf32, #tpu.memory_space<vmem>>, vector<16x128xf32>,
    %cst_10 = arith.constant 0.000000e+00 : f32
    %9 = vector.broadcast %cst_10 : f32 to vector<2x32xf32>
    %cst_11 = arith.constant 0.000000e+00 : f32
    %10 = vector.broadcast %cst_11 : f32 to vector<2x32xf32>
    %c0_12 = arith.constant 0 : index
    %c0_13 = arith.constant 0 : index
    %11 = vector.load %arg10[%c0_12, %c0_13] : memref<16x128xf32, #tpu.memory_space<vmem>>, vector<2x128xf32>
    %cst_14 = arith.constant dense<0.000000e+00> : vector<2x128xf32>
    %12 = tpu.matmul %10, %0, %cst_14 {dimension_numbers = #tpu.dot_dimension_numbers<[1], [0], [0], [1], [0, 0, 1, 1], [], []>} : vector<2x32xf32>, vector<32x128xf32>, vector<2x128xf32> -> vector<2x128xf32>
    %13 = arith.addf %11, %12 : vector<2x128xf32>
    %14 = arith.negf %13 : vector<2x128xf32>
    %15 = math.exp %14 : vector<2x128xf32>
    %cst_15 = arith.constant 1.000000e+00 : f32
    %16 = vector.broadcast %cst_15 : f32 to vector<2x128xf32>
    %17 = arith.addf %16, %15 : vector<2x128xf32>
    %18 = arith.divf %16, %17 : vector<2x128xf32>
    %19 = math.tanh %13 : vector<2x128xf32>
    %20 = vector.extract_strided_slice %18 {offsets = [0, 0], sizes = [2, 32], strides = [1, 1]} : vector<2x128xf32> to vector<2x32xf32>
    %21 = vector.extract_strided_slice %18 {offsets = [0, 32], sizes = [2, 32], strides = [1, 1]} : vector<2x128xf32> to vector<2x32xf32>
    %22 = vector.extract_strided_slice %19 {offsets = [0, 64], sizes = [2, 32], strides = [1, 1]} : vector<2x128xf32> to vector<2x32xf32>
    %23 = vector.extract_strided_slice %18 {offsets = [0, 96], sizes = [2, 32], strides = [1, 1]} : vector<2x128xf32> to vector<2x32xf32>
    %24 = arith.mulf %20, %22 : vector<2x32xf32>
    %25 = arith.mulf %23, %9 : vector<2x32xf32>
    %26 = arith.addf %24, %25 : vector<2x32xf32>
    %27 = math.tanh %26 : vector<2x32xf32>
    %28 = arith.mulf %21, %27 : vector<2x32xf32>
    %c2 = arith.constant 2 : index
    %c0_16 = arith.constant 0 : index
    %29 = vector.load %arg10[%c2, %c0_16] : memref<16x128xf32, #tpu.memory_space<vmem>>, vector<2x128xf32>
    %cst_17 = arith.constant dense<0.000000e+00> : vector<2x128xf32>
    %30 = tpu.matmul %28, %0, %cst_17 {dimension_numbers = #tpu.dot_dimension_numbers<[1], [0], [0], [1], [0, 0, 1, 1], [], []>} : vector<2x32xf32>, vector<32x128xf32>, vector<2x128xf32> -> vector<2x128xf32>
    %31 = arith.addf %29, %30 : vector<2x128xf32>
    %32 = arith.negf %31 : vector<2x128xf32>
    %33 = math.exp %32 : vector<2x128xf32>
    %cst_18 = arith.constant 1.000000e+00 : f32
    %34 = vector.broadcast %cst_18 : f32 to vector<2x128xf32>
    %35 = arith.addf %34, %33 : vector<2x128xf32>
    %36 = arith.divf %34, %35 : vector<2x128xf32>
    %37 = math.tanh %31 : vector<2x128xf32>
    %38 = vector.extract_strided_slice %36 {offsets = [0, 0], sizes = [2, 32], strides = [1, 1]} : vector<2x128xf32> to vector<2x32xf32>
    %39 = vector.extract_strided_slice %36 {offsets = [0, 32], sizes = [2, 32], strides = [1, 1]} : vector<2x128xf32> to vector<2x32xf32>
    %40 = vector.extract_strided_slice %37 {offsets = [0, 64], sizes = [2, 32], strides = [1, 1]} : vector<2x128xf32> to vector<2x32xf32>
    %41 = vector.extract_strided_slice %36 {offsets = [0, 96], sizes = [2, 32], strides = [1, 1]} : vector<2x128xf32> to vector<2x32xf32>
    %42 = arith.mulf %38, %40 : vector<2x32xf32>
    %43 = arith.mulf %41, %26 : vector<2x32xf32>
    %44 = arith.addf %42, %43 : vector<2x32xf32>
    %45 = math.tanh %44 : vector<2x32xf32>
    %46 = arith.mulf %39, %45 : vector<2x32xf32>
    %c4 = arith.constant 4 : index
    %c0_19 = arith.constant 0 : index
    %47 = vector.load %arg10[%c4, %c0_19] : memref<16x128xf32, #tpu.memory_space<vmem>>, vector<2x128xf32>
    %cst_20 = arith.constant dense<0.000000e+00> : vector<2x128xf32>
    %48 = tpu.matmul %46, %0, %cst_20 {dimension_numbers = #tpu.dot_dimension_numbers<[1], [0], [0], [1], [0, 0, 1, 1], [], []>} : vector<2x32xf32>, vector<32x128xf32>, vector<2x128xf32> -> vector<2x128xf32>
    %49 = arith.addf %47, %48 : vector<2x128xf32>
    %50 = arith.negf %49 : vector<2x128xf32>
    %51 = math.exp %50 : vector<2x128xf32>
    %cst_21 = arith.constant 1.000000e+00 : f32
    %52 = vector.broadcast %cst_21 : f32 to vector<2x128xf32>
    %53 = arith.addf %52, %51 : vector<2x128xf32>
    %54 = arith.divf %52, %53 : vector<2x128xf32>
    %55 = math.tanh %49 : vector<2x128xf32>
    %56 = vector.extract_strided_slice %54 {offsets = [0, 0], sizes = [2, 32], strides = [1, 1]} : vector<2x128xf32> to vector<2x32xf32>
    %57 = vector.extract_strided_slice %54 {offsets = [0, 32], sizes = [2, 32], strides = [1, 1]} : vector<2x128xf32> to vector<2x32xf32>
    %58 = vector.extract_strided_slice %55 {offsets = [0, 64], sizes = [2, 32], strides = [1, 1]} : vector<2x128xf32> to vector<2x32xf32>
    %59 = vector.extract_strided_slice %54 {offsets = [0, 96], sizes = [2, 32], strides = [1, 1]} : vector<2x128xf32> to vector<2x32xf32>
    %60 = arith.mulf %56, %58 : vector<2x32xf32>
    %61 = arith.mulf %59, %44 : vector<2x32xf32>
    %62 = arith.addf %60, %61 : vector<2x32xf32>
    %63 = math.tanh %62 : vector<2x32xf32>
    %64 = arith.mulf %57, %63 : vector<2x32xf32>
    %c6 = arith.constant 6 : index
    %c0_22 = arith.constant 0 : index
    %65 = vector.load %arg10[%c6, %c0_22] : memref<16x128xf32, #tpu.memory_space<vmem>>, vector<2x128xf32>
    %cst_23 = arith.constant dense<0.000000e+00> : vector<2x128xf32>
    %66 = tpu.matmul %64, %0, %cst_23 {dimension_numbers = #tpu.dot_dimension_numbers<[1], [0], [0], [1], [0, 0, 1, 1], [], []>} : vector<2x32xf32>, vector<32x128xf32>, vector<2x128xf32> -> vector<2x128xf32>
    %67 = arith.addf %65, %66 : vector<2x128xf32>
    %68 = arith.negf %67 : vector<2x128xf32>
    %69 = math.exp %68 : vector<2x128xf32>
    %cst_24 = arith.constant 1.000000e+00 : f32
    %70 = vector.broadcast %cst_24 : f32 to vector<2x128xf32>
    %71 = arith.addf %70, %69 : vector<2x128xf32>
    %72 = arith.divf %70, %71 : vector<2x128xf32>
    %73 = math.tanh %67 : vector<2x128xf32>
    %74 = vector.extract_strided_slice %72 {offsets = [0, 0], sizes = [2, 32], strides = [1, 1]} : vector<2x128xf32> to vector<2x32xf32>
    %75 = vector.extract_strided_slice %72 {offsets = [0, 32], sizes = [2, 32], strides = [1, 1]} : vector<2x128xf32> to vector<2x32xf32>
    %76 = vector.extract_strided_slice %73 {offsets = [0, 64], sizes = [2, 32], strides = [1, 1]} : vector<2x128xf32> to vector<2x32xf32>
    %77 = vector.extract_strided_slice %72 {offsets = [0, 96], sizes = [2, 32], strides = [1, 1]} : vector<2x128xf32> to vector<2x32xf32>
    %78 = arith.mulf %74, %76 : vector<2x32xf32>
    %79 = arith.mulf %77, %62 : vector<2x32xf32>
    %80 = arith.addf %78, %79 : vector<2x32xf32>
    %81 = math.tanh %80 : vector<2x32xf32>
    %82 = arith.mulf %75, %81 : vector<2x32xf32>
    %c8 = arith.constant 8 : index
    %c0_25 = arith.constant 0 : index
    %83 = vector.load %arg10[%c8, %c0_25] : memref<16x128xf32, #tpu.memory_space<vmem>>, vector<2x128xf32>
    %cst_26 = arith.constant dense<0.000000e+00> : vector<2x128xf32>
    %84 = tpu.matmul %82, %0, %cst_26 {dimension_numbers = #tpu.dot_dimension_numbers<[1], [0], [0], [1], [0, 0, 1, 1], [], []>} : vector<2x32xf32>, vector<32x128xf32>, vector<2x128xf32> -> vector<2x128xf32>
    %85 = arith.addf %83, %84 : vector<2x128xf32>
    %86 = arith.negf %85 : vector<2x128xf32>
    %87 = math.exp %86 : vector<2x128xf32>
    %cst_27 = arith.constant 1.000000e+00 : f32
    %88 = vector.broadcast %cst_27 : f32 to vector<2x128xf32>
    %89 = arith.addf %88, %87 : vector<2x128xf32>
    %90 = arith.divf %88, %89 : vector<2x128xf32>
    %91 = math.tanh %85 : vector<2x128xf32>
    %92 = vector.extract_strided_slice %90 {offsets = [0, 0], sizes = [2, 32], strides = [1, 1]} : vector<2x128xf32> to vector<2x32xf32>
    %93 = vector.extract_strided_slice %90 {offsets = [0, 32], sizes = [2, 32], strides = [1, 1]} : vector<2x128xf32> to vector<2x32xf32>
    %94 = vector.extract_strided_slice %91 {offsets = [0, 64], sizes = [2, 32], strides = [1, 1]} : vector<2x128xf32> to vector<2x32xf32>
    %95 = vector.extract_strided_slice %90 {offsets = [0, 96], sizes = [2, 32], strides = [1, 1]} : vector<2x128xf32> to vector<2x32xf32>
    %96 = arith.mulf %92, %94 : vector<2x32xf32>
    %97 = arith.mulf %95, %80 : vector<2x32xf32>
    %98 = arith.addf %96, %97 : vector<2x32xf32>
    %99 = math.tanh %98 : vector<2x32xf32>
    %100 = arith.mulf %93, %99 : vector<2x32xf32>
    %c10 = arith.constant 10 : index
    %c0_28 = arith.constant 0 : index
    %101 = vector.load %arg10[%c10, %c0_28] : memref<16x128xf32, #tpu.memory_space<vmem>>, vector<2x128xf32>
    %cst_29 = arith.constant dense<0.000000e+00> : vector<2x128xf32>
    %102 = tpu.matmul %100, %0, %cst_29 {dimension_numbers = #tpu.dot_dimension_numbers<[1], [0], [0], [1], [0, 0, 1, 1], [], []>} : vector<2x32xf32>, vector<32x128xf32>, vector<2x128xf32> -> vector<2x128xf32>
    %103 = arith.addf %101, %102 : vector<2x128xf32>
    %104 = arith.negf %103 : vector<2x128xf32>
    %105 = math.exp %104 : vector<2x128xf32>
    %cst_30 = arith.constant 1.000000e+00 : f32
    %106 = vector.broadcast %cst_30 : f32 to vector<2x128xf32>
    %107 = arith.addf %106, %105 : vector<2x128xf32>
    %108 = arith.divf %106, %107 : vector<2x128xf32>
    %109 = math.tanh %103 : vector<2x128xf32>
    %110 = vector.extract_strided_slice %108 {offsets = [0, 0], sizes = [2, 32], strides = [1, 1]} : vector<2x128xf32> to vector<2x32xf32>
    %111 = vector.extract_strided_slice %108 {offsets = [0, 32], sizes = [2, 32], strides = [1, 1]} : vector<2x128xf32> to vector<2x32xf32>
    %112 = vector.extract_strided_slice %109 {offsets = [0, 64], sizes = [2, 32], strides = [1, 1]} : vector<2x128xf32> to vector<2x32xf32>
    %113 = vector.extract_strided_slice %108 {offsets = [0, 96], sizes = [2, 32], strides = [1, 1]} : vector<2x128xf32> to vector<2x32xf32>
    %114 = arith.mulf %110, %112 : vector<2x32xf32>
    %115 = arith.mulf %113, %98 : vector<2x32xf32>
    %116 = arith.addf %114, %115 : vector<2x32xf32>
    %117 = math.tanh %116 : vector<2x32xf32>
    %118 = arith.mulf %111, %117 : vector<2x32xf32>
    %c12 = arith.constant 12 : index
    %c0_31 = arith.constant 0 : index
    %119 = vector.load %arg10[%c12, %c0_31] : memref<16x128xf32, #tpu.memory_space<vmem>>, vector<2x128xf32>
    %cst_32 = arith.constant dense<0.000000e+00> : vector<2x128xf32>
    %120 = tpu.matmul %118, %0, %cst_32 {dimension_numbers = #tpu.dot_dimension_numbers<[1], [0], [0], [1], [0, 0, 1, 1], [], []>} : vector<2x32xf32>, vector<32x128xf32>, vector<2x128xf32> -> vector<2x128xf32>
    %121 = arith.addf %119, %120 : vector<2x128xf32>
    %122 = arith.negf %121 : vector<2x128xf32>
    %123 = math.exp %122 : vector<2x128xf32>
    %cst_33 = arith.constant 1.000000e+00 : f32
    %124 = vector.broadcast %cst_33 : f32 to vector<2x128xf32>
    %125 = arith.addf %124, %123 : vector<2x128xf32>
    %126 = arith.divf %124, %125 : vector<2x128xf32>
    %127 = math.tanh %121 : vector<2x128xf32>
    %128 = vector.extract_strided_slice %126 {offsets = [0, 0], sizes = [2, 32], strides = [1, 1]} : vector<2x128xf32> to vector<2x32xf32>
    %129 = vector.extract_strided_slice %126 {offsets = [0, 32], sizes = [2, 32], strides = [1, 1]} : vector<2x128xf32> to vector<2x32xf32>
    %130 = vector.extract_strided_slice %127 {offsets = [0, 64], sizes = [2, 32], strides = [1, 1]} : vector<2x128xf32> to vector<2x32xf32>
    %131 = vector.extract_strided_slice %126 {offsets = [0, 96], sizes = [2, 32], strides = [1, 1]} : vector<2x128xf32> to vector<2x32xf32>
    %132 = arith.mulf %128, %130 : vector<2x32xf32>
    %133 = arith.mulf %131, %116 : vector<2x32xf32>
    %134 = arith.addf %132, %133 : vector<2x32xf32>
    %135 = math.tanh %134 : vector<2x32xf32>
    %136 = arith.mulf %129, %135 : vector<2x32xf32>
    %c14 = arith.constant 14 : index
    %c0_34 = arith.constant 0 : index
    %137 = vector.load %arg10[%c14, %c0_34] : memref<16x128xf32, #tpu.memory_space<vmem>>, vector<2x128xf32>
    %cst_35 = arith.constant dense<0.000000e+00> : vector<2x128xf32>
    %138 = tpu.matmul %136, %0, %cst_35 {dimension_numbers = #tpu.dot_dimension_numbers<[1], [0], [0], [1], [0, 0, 1, 1], [], []>} : vector<2x32xf32>, vector<32x128xf32>, vector<2x128xf32> -> vector<2x128xf32>
    %139 = arith.addf %137, %138 : vector<2x128xf32>
    %140 = arith.negf %139 : vector<2x128xf32>
    %141 = math.exp %140 : vector<2x128xf32>
    %cst_36 = arith.constant 1.000000e+00 : f32
    %142 = vector.broadcast %cst_36 : f32 to vector<2x128xf32>
    %143 = arith.addf %142, %141 : vector<2x128xf32>
    %144 = arith.divf %142, %143 : vector<2x128xf32>
    %145 = math.tanh %139 : vector<2x128xf32>
    %146 = vector.extract_strided_slice %144 {offsets = [0, 0], sizes = [2, 32], strides = [1, 1]} : vector<2x128xf32> to vector<2x32xf32>
    %147 = vector.extract_strided_slice %144 {offsets = [0, 32], sizes = [2, 32], strides = [1, 1]} : vector<2x128xf32> to vector<2x32xf32>
    %148 = vector.extract_strided_slice %145 {offsets = [0, 64], sizes = [2, 32], strides = [1, 1]} : vector<2x128xf32> to vector<2x32xf32>
    %149 = vector.extract_strided_slice %144 {offsets = [0, 96], sizes = [2, 32], strides = [1, 1]} : vector<2x128xf32> to vector<2x32xf32>
    %150 = arith.mulf %146, %148 : vector<2x32xf32>
    %151 = arith.mulf %149, %134 : vector<2x32xf32>
    %152 = arith.addf %150, %151 : vector<2x32xf32>
    %153 = math.tanh %152 : vector<2x32xf32>
    %154 = arith.mulf %147, %153 : vector<2x32xf32>
    %c14_37 = arith.constant 14 : index
    %c0_38 = arith.constant 0 : index
    %155 = vector.load %arg10[%c14_37, %c0_38] : memref<16x128xf32, #tpu.memory_space<vmem>>, vector<2x128xf32>
    %cst_39 = arith.constant 0.000000e+00 : f32
    %156 = vector.broadcast %cst_39 : f32 to vector<2x32xf32>
    %157 = arith.negf %155 : vector<2x128xf32>
    %158 = math.exp %157 : vector<2x128xf32>
    %cst_40 = arith.constant 1.000000e+00 : f32
    %159 = vector.broadcast %cst_40 : f32 to vector<2x128xf32>
    %160 = arith.addf %159, %158 : vector<2x128xf32>
    %161 = arith.divf %159, %160 : vector<2x128xf32>
    %162 = math.tanh %155 : vector<2x128xf32>
    %163 = vector.extract_strided_slice %161 {offsets = [0, 0], sizes = [2, 32], strides = [1, 1]} : vector<2x128xf32> to vector<2x32xf32>
    %164 = vector.extract_strided_slice %161 {offsets = [0, 32], sizes = [2, 32], strides = [1, 1]} : vector<2x128xf32> to vector<2x32xf32>
    %165 = vector.extract_strided_slice %162 {offsets = [0, 64], sizes = [2, 32], strides = [1, 1]} : vector<2x128xf32> to vector<2x32xf32>
    %166 = vector.extract_strided_slice %161 {offsets = [0, 96], sizes = [2, 32], strides = [1, 1]} : vector<2x128xf32> to vector<2x32xf32>
    %167 = arith.mulf %163, %165 : vector<2x32xf32>
    %168 = arith.mulf %166, %156 : vector<2x32xf32>
    %169 = arith.addf %167, %168 : vector<2x32xf32>
    %170 = math.tanh %169 : vector<2x32xf32>
    %171 = arith.mulf %164, %170 : vector<2x32xf32>
    %172 = vector.extract_strided_slice %154 {offsets = [0, 0], sizes = [1, 32], strides = [1, 1]} : vector<2x32xf32> to vector<1x32xf32>
    %173 = vector.extract_strided_slice %154 {offsets = [1, 0], sizes = [1, 32], strides = [1, 1]} : vector<2x32xf32> to vector<1x32xf32>
    %174 = vector.extract_strided_slice %171 {offsets = [0, 0], sizes = [1, 32], strides = [1, 1]} : vector<2x32xf32> to vector<1x32xf32>
    %175 = vector.extract_strided_slice %171 {offsets = [1, 0], sizes = [1, 32], strides = [1, 1]} : vector<2x32xf32> to vector<1x32xf32>
    %176 = arith.mulf %172, %173 : vector<1x32xf32>
    %c0_41 = arith.constant 0 : index
    %c0_42 = arith.constant 0 : index
    %177 = vector.load %arg11[%c0_41, %c0_42] : memref<1x128xf32, #tpu.memory_space<vmem>>, vector<1x32xf32>
    tpu.vector_store %arg11[%c0_41, %c0_42], %176 {strides = array<i32>} : memref<1x128xf32, #tpu.memory_space<vmem>>, vector<1x32xf32>,
    %178 = arith.mulf %174, %175 : vector<1x32xf32>
    %c0_43 = arith.constant 0 : index
    %c32 = arith.constant 32 : index
    %179 = vector.load %arg11[%c0_43, %c32] : memref<1x128xf32, #tpu.memory_space<vmem>>, vector<1x32xf32>
    tpu.vector_store %arg11[%c0_43, %c32], %178 {strides = array<i32>} : memref<1x128xf32, #tpu.memory_space<vmem>>, vector<1x32xf32>,
    %180 = arith.subf %172, %173 : vector<1x32xf32>
    %181 = math.absf %180 : vector<1x32xf32>
    %c0_44 = arith.constant 0 : index
    %c64 = arith.constant 64 : index
    %182 = vector.load %arg11[%c0_44, %c64] : memref<1x128xf32, #tpu.memory_space<vmem>>, vector<1x32xf32>
    tpu.vector_store %arg11[%c0_44, %c64], %181 {strides = array<i32>} : memref<1x128xf32, #tpu.memory_space<vmem>>, vector<1x32xf32>,
    %183 = arith.subf %174, %175 : vector<1x32xf32>
    %184 = math.absf %183 : vector<1x32xf32>
    %c0_45 = arith.constant 0 : index
    %c96 = arith.constant 96 : index
    %185 = vector.load %arg11[%c0_45, %c96] : memref<1x128xf32, #tpu.memory_space<vmem>>, vector<1x32xf32>
    tpu.vector_store %arg11[%c0_45, %c96], %184 {strides = array<i32>} : memref<1x128xf32, #tpu.memory_space<vmem>>, vector<1x32xf32>,
    %c0_46 = arith.constant 0 : index
    %c0_47 = arith.constant 0 : index
    %186 = vector.load %arg11[%c0_46, %c0_47] : memref<1x128xf32, #tpu.memory_space<vmem>>, vector<1x128xf32>
    %c0_48 = arith.constant 0 : index
    %c0_49 = arith.constant 0 : index
    %187 = vector.load %arg5[%c0_48, %c0_49] : memref<128x32xf32, #tpu.memory_space<vmem>>, vector<128x32xf32>
    %cst_50 = arith.constant dense<0.000000e+00> : vector<1x32xf32>
    %188 = tpu.matmul %186, %187, %cst_50 {dimension_numbers = #tpu.dot_dimension_numbers<[1], [0], [0], [1], [0, 0, 1, 1], [], []>} : vector<1x128xf32>, vector<128x32xf32>, vector<1x32xf32> -> vector<1x32xf32>
    %c0_51 = arith.constant 0 : index
    %c0_52 = arith.constant 0 : index
    %189 = vector.load %arg6[%c0_51, %c0_52] : memref<1x32xf32, #tpu.memory_space<vmem>>, vector<1x32xf32>
    %190 = arith.addf %188, %189 : vector<1x32xf32>
    %191 = arith.negf %190 : vector<1x32xf32>
    %192 = math.exp %191 : vector<1x32xf32>
    %cst_53 = arith.constant 1.000000e+00 : f32
    %193 = vector.broadcast %cst_53 : f32 to vector<1x32xf32>
    %194 = arith.addf %193, %192 : vector<1x32xf32>
    %195 = arith.divf %193, %194 : vector<1x32xf32>
    %c0_54 = arith.constant 0 : index
    %c0_55 = arith.constant 0 : index
    %196 = vector.load %arg7[%c0_54, %c0_55] : memref<32x5xf32, #tpu.memory_space<vmem>>, vector<32x5xf32>
    %cst_56 = arith.constant dense<0.000000e+00> : vector<1x5xf32>
    %197 = tpu.matmul %195, %196, %cst_56 {dimension_numbers = #tpu.dot_dimension_numbers<[1], [0], [0], [1], [0, 0, 1, 1], [], []>} : vector<1x32xf32>, vector<32x5xf32>, vector<1x5xf32> -> vector<1x5xf32>
    %c0_57 = arith.constant 0 : index
    %c0_58 = arith.constant 0 : index
    %198 = vector.load %arg8[%c0_57, %c0_58] : memref<1x5xf32, #tpu.memory_space<vmem>>, vector<1x5xf32>
    %199 = arith.addf %197, %198 : vector<1x5xf32>
    %cst_59 = arith.constant dense<0xFF800000> : vector<1xf32>
    %200 = vector.multi_reduction <maximumf>, %199, %cst_59 [1] : vector<1x5xf32> to vector<1xf32>
    %201 = vector.shape_cast %200 : vector<1xf32> to vector<1x1xf32>
    %202 = vector.broadcast %201 : vector<1x1xf32> to vector<1x5xf32>
    %203 = arith.subf %199, %202 : vector<1x5xf32>
    %204 = math.exp %203 : vector<1x5xf32>
    %cst_60 = arith.constant dense<0.000000e+00> : vector<1xf32>
    %205 = vector.multi_reduction <add>, %204, %cst_60 [1] : vector<1x5xf32> to vector<1xf32>
    %206 = vector.shape_cast %205 : vector<1xf32> to vector<1x1xf32>
    %207 = math.log %206 : vector<1x1xf32>
    %208 = vector.broadcast %207 : vector<1x1xf32> to vector<1x5xf32>
    %209 = arith.subf %203, %208 : vector<1x5xf32>
    %c0_61 = arith.constant 0 : index
    %c0_62 = arith.constant 0 : index
    %c0_63 = arith.constant 0 : index
    %210 = vector.load %arg9[%c0_61, %c0_62, %c0_63] : memref<1x1x5xf32, #tpu.memory_space<vmem>>, vector<1x1x5xf32>
    %211 = vector.shape_cast %210 : vector<1x1x5xf32> to vector<1x5xf32>
    %212 = vector.shape_cast %209 : vector<1x5xf32> to vector<1x1x5xf32>
    tpu.vector_store %arg9[%c0_61, %c0_62, %c0_63], %212 {strides = array<i32>} : memref<1x1x5xf32, #tpu.memory_space<vmem>>, vector<1x1x5xf32>,
    return
  }
  func.func @transform_0(%arg0: i32) -> (i32, i32, i32) {
    %c0_i32 = arith.constant 0 : i32
    %c0_i32_0 = arith.constant 0 : i32
    %c0_i32_1 = arith.constant 0 : i32
    return %arg0, %c0_i32, %c0_i32_0 : i32, i32, i32
  }
  func.func @transform_1(%arg0: i32) -> (i32, i32) {
    %c0_i32 = arith.constant 0 : i32
    %c0_i32_0 = arith.constant 0 : i32
    %c0_i32_1 = arith.constant 0 : i32
    return %c0_i32, %c0_i32_0 : i32, i32
  }
  func.func @transform_2(%arg0: i32) -> (i32, i32) {
    %c0_i32 = arith.constant 0 : i32
    %c0_i32_0 = arith.constant 0 : i32
    %c0_i32_1 = arith.constant 0 : i32
    return %c0_i32, %c0_i32_0 : i32, i32
  }
  func.func @transform_3(%arg0: i32) -> (i32, i32) {
    %c0_i32 = arith.constant 0 : i32
    %c0_i32_0 = arith.constant 0 : i32
    %c0_i32_1 = arith.constant 0 : i32
    return %c0_i32, %c0_i32_0 : i32, i32
  }
  func.func @transform_4(%arg0: i32) -> (i32, i32) {
    %c0_i32 = arith.constant 0 : i32
    %c0_i32_0 = arith.constant 0 : i32
    %c0_i32_1 = arith.constant 0 : i32
    return %c0_i32, %c0_i32_0 : i32, i32
  }
  func.func @transform_5(%arg0: i32) -> (i32, i32) {
    %c0_i32 = arith.constant 0 : i32
    %c0_i32_0 = arith.constant 0 : i32
    %c0_i32_1 = arith.constant 0 : i32
    return %c0_i32, %c0_i32_0 : i32, i32
  }
  func.func @transform_6(%arg0: i32) -> (i32, i32) {
    %c0_i32 = arith.constant 0 : i32
    %c0_i32_0 = arith.constant 0 : i32
    %c0_i32_1 = arith.constant 0 : i32
    return %c0_i32, %c0_i32_0 : i32, i32
  }
  func.func @transform_7(%arg0: i32) -> (i32, i32) {
    %c0_i32 = arith.constant 0 : i32
    %c0_i32_0 = arith.constant 0 : i32
    %c0_i32_1 = arith.constant 0 : i32
    return %c0_i32, %c0_i32_0 : i32, i32
  }
  func.func @transform_8(%arg0: i32) -> (i32, i32, i32) {
    %c0_i32 = arith.constant 0 : i32
    %c0_i32_0 = arith.constant 0 : i32
    %c0_i32_1 = arith.constant 0 : i32
    return %arg0, %c0_i32, %c0_i32_0 : i32, i32, i32
  }
}

</mosaic_0001>

<bundles_post_ra>
// kernel: similarity_treelstm_forward.1
= control target key start
LH: loop header
LB: loop body
LE: loop exit
PB: predicated region body
PF: predicated region fallthrough
CT: control target
= control target key end

     0   :  { %s1179_s0 = inlined_call_operand.vmem [shape: f32[1,16,32], index: 0, kind: input, shape index: {}]   ;;  %s1180_s1 = inlined_call_operand.vmem [shape: f32[32,128], index: 1, kind: input, shape index: {}]   ;;  %s1181_s2 = inlined_call_operand.vmem [shape: f32[1,128], index: 2, kind: input, shape index: {}]   ;;  %s1182_s3 = inlined_call_operand.vmem [shape: f32[32,128], index: 3, kind: input, shape index: {}]   ;;  %s1183_s4 = inlined_call_operand.vmem [shape: f32[128,32], index: 4, kind: input, shape index: {}]   ;;  %s1184_s5 = inlined_call_operand.vmem [shape: f32[1,32], index: 5, kind: input, shape index: {}]   ;;  %s1185_s6 = inlined_call_operand.vmem [shape: f32[32,5], index: 6, kind: input, shape index: {}]   ;;  %s1186_s7 = inlined_call_operand.vmem [shape: f32[1,5], index: 7, kind: input, shape index: {}]   ;;  %s1187_s8 = inlined_call_operand.hbm [shape: f32[1,1,5], index: 8, kind: output, shape index: {}]  }
   0x1   :  { %v39_v0 = vld [vmem:[%s1180_s1 + $0x18] sm:$0xff]  ;;  %v38_v1 = vld [vmem:[%s1180_s1 + $0x10] sm:$0xff]  ;;  %v37_v3 = vld [vmem:[%s1180_s1 + $0x8] sm:$0xff] }
   0x2   :  { %63 = vmatpush.msra.mxu0 %v39_v0  ;;  %v989_v2 = vld [vmem:[%s1182_s3 + $0x18] sm:$0xff]  ;;  %v998_v4 = vld [vmem:[%s1182_s3 + $0x10] sm:$0xff]  ;;  %v1004_v5 = vld [vmem:[%s1182_s3 + $0x8] sm:$0xff] }
   0x3   :  { %92 = vmatpush.msra.mxu1 %v989_v2  ;;  %224 = vmatpush.msra.mxu3 %v989_v2 }
   0x4   :  { %64 = vmatpush.msra.mxu0 %v38_v1 }
   0x5   :  { %13 = vsyncpa [#allocation5], 0  ;;  %v36_v6 = vld [vmem:[%s1180_s1] sm:$0xff]  ;;  %93 = vmatpush.msra.mxu1 %v998_v4  ;;  %225 = vmatpush.msra.mxu3 %v998_v4  ;;  %vm44_vm0 = vcmask 261120   ;;  %v930_v9 = vmov 0.0   ;;  %s931_s23 = smov 64  }
   0x6   :  { %65 = vmatpush.msra.mxu0 %v37_v3  ;;  %v34_v7 = vld [vmem:[%s1179_s0] sm:$0xff]  ;;  %s933_s24 = smov 96   ;;  %v35_v36 = vld [vmem:[%s1179_s0 + $0x8] sm:$0xff]  ;;  %s934_s19 = smov [#allocation4]  }
   0x7   :  { %v1017_v8 = vld [vmem:[%s1182_s3] sm:$0xff]  ;;  %94 = vmatpush.msra.mxu1 %v1004_v5  ;;  %226 = vmatpush.msra.mxu3 %v1004_v5  ;;  %s787_s20 = sshll.u32 %s934_s19, 4  ;;  %s789_s22 = sshll.u32 %s1187_s8, 4  ;;  %s788_s20 = int_to_ptr.vmem [resolvable:$true] %s787_s20  ;;  %s790_s22 = int_to_ptr.hbm [resolvable:$true] %s789_s22 }
   0x8   :  { %66 = vmatpush.msra.mxu0 %v36_v6  ;;  %v823_v10 = vld [vmem:[%s1181_s2] ss:$0 sm:$0xff]  ;;  %s932_s2 = smov 32  }
   0x9   :  { %798 = vmatmul.msk.f32.vlgmr.msra.gmra.mxu0 %vm44_vm0, %v34_v7  ;;  %95 = vmatpush.msra.mxu1 %v1017_v8 }
   0xa   :  { %96 = vmatmul.f32.vlgmr.msra.gmra.mxu1 %v930_v9  ;;  %156 = vmatpush.msrb.mxu0 %v989_v2 }
   0xb   :  { %227 = vmatpush.msra.mxu3 %v1017_v8  ;;  %292 = vmatpush.msrb.mxu1 %v989_v2 }
   0xc   :  { %157 = vmatpush.msrb.mxu0 %v998_v4 }
   0xd   :  { %428 = vmatpush.msrb.mxu3 %v989_v2  ;;  %293 = vmatpush.msrb.mxu1 %v998_v4 }
   0xe   :  { %158 = vmatpush.msrb.mxu0 %v1004_v5 }
   0xf   :  { %429 = vmatpush.msrb.mxu3 %v998_v4  ;;  %294 = vmatpush.msrb.mxu1 %v1004_v5 }
  0x10   :  { %159 = vmatpush.msrb.mxu0 %v1017_v8 }
  0x11   :  { %430 = vmatpush.msrb.mxu3 %v1004_v5  ;;  %295 = vmatpush.msrb.mxu1 %v1017_v8 }
  0x12   :  { %496 = vmatpush.msra.mxu0 %v989_v2 }
  0x13   :  { %360 = vmatpush.msra.mxu1 %v989_v2  ;;  %431 = vmatpush.msrb.mxu3 %v1017_v8 }
  0x14   :  { %497 = vmatpush.msra.mxu0 %v998_v4 }
  0x15   :  { %361 = vmatpush.msra.mxu1 %v998_v4  ;;  %799 = vmatmul.msk.f32.gmra.mxu0 %vm44_vm0, %v35_v36 }
  0x16   :  { %498 = vmatpush.msra.mxu0 %v1004_v5 }
  0x17   :  { %362 = vmatpush.msra.mxu1 %v1004_v5 }
  0x18   :  { %499 = vmatpush.msra.mxu0 %v1017_v8 }
  0x19   :  { %363 = vmatpush.msra.mxu1 %v1017_v8 }
  0x86   :  { %v68_v11 = vpop.f32.mrf.mxu0 }
  0x87   :  { %v69_v12 = vadd.f32 %v823_v10, %v68_v11  ;;  %v97_v13 = vpop.f32.mrf.mxu1 }
  0x89   :  { %74 = vst [vmem:[#allocation2] sm:$0xff] %v69_v12 }
  0x90   :  { %v76_v14 = vld [vmem:[#allocation2] sm:$0x3]  ;;  %v138_v42 = vld [vmem:[#allocation2 + $0x2] sm:$0x3]  ;;  %v206_v9 = vld [vmem:[#allocation2 + $0x4] sm:$0x3] }
  0x91   :  { %v100_v15 = vadd.f32 %v97_v13, %v76_v14  ;;  %v274_v36 = vld [vmem:[#allocation2 + $0x6] sm:$0x3] }
  0x92   :  { %v71_v39 = vpop.f32.mrf.mxu0 }
  0x93   :  { %v800_v16 = vmul.f32 -1.442695, %v100_v15  ;;  %824 = vtanh.f32 %v100_v15  ;;  %v72_v40 = vadd.f32 %v823_v10, %v71_v39 }
  0x95   :  { %826 = vpow2.f32 %v800_v16  ;;  %75 = vst [vmem:[#allocation2 + $0x8] sm:$0xff] %v72_v40 }
  0x99   :  { %v825_v17 = vpop.eup %824 }
  0x9a   :  { %122 = vrot.lane.b32.xlu0 %v825_v17, %s931_s23 }
  0x9b   :  { %v827_v18 = vpop.eup %826 }
  0x9c   :  { %v104_v19 = vadd.f32 1.0, %v827_v18 }
  0x9e   :  { %828 = vrcp.f32 %v104_v19  ;;  %v116_v23 = vand.u32 2147483648, %v104_v19  ;;  %v114_v25 = vand.u32 2147483647, %v104_v19  ;;  %vm110_vm2 = vweird.f32 %v104_v19 }
  0xa0   :  { %v117_v27 = vor.u32 1.1754944e-38, %v116_v23  ;;  %vm115_vm4 = vcmp.eq.f32.partialorder %v114_v25, 8.507059e+37 }
  0xa4   :  { %v829_v20 = vpop.eup %828 }
  0xa5   :  { %v106_v21 = vmul.f32 %v829_v20, %v104_v19  ;;  %vm111_vm1 = vweird.f32 %v829_v20 }
  0xa6   :  { %vm112_vm3 = vmor %vm110_vm2, %vm111_vm1 }
  0xa7   :  { %v107_v22 = vsub.f32 1.0, %v106_v21 }
  0xa9   :  { %v108_v24 = vmul.f32 %v829_v20, %v107_v22 }
  0xab   :  { %v109_v26 = vadd.f32 %v829_v20, %v108_v24 }
  0xad   :  { %v113_v28 = vsel %vm112_vm3, %v829_v20, %v109_v26 }
  0xae   :  { %v118_v29 = vsel %vm115_vm4, %v117_v27, %v113_v28 }
  0xaf   :  { %v126_v30 = vmul.f32 0.0, %v118_v29 }
  0xb1   :  { %128 = vrot.lane.b32.xlu0 %v126_v30, %s932_s2 }
 0x10c   :  { %v123_v31 = vpop.permute.xlu0 %122 }
 0x10d   :  { %v125_v32 = vmul.f32 %v123_v31, %v118_v29 }
 0x123   :  { %v129_v33 = vpop.permute.xlu0 %128 }
 0x124   :  { %v131_v34 = vadd.f32 %v129_v33, %v125_v32 }
 0x126   :  { %830 = vtanh.f32 %v131_v34  ;;  %191 = vrot.lane.b32.xlu2 %v131_v34, %s933_s24 }
 0x12c   :  { %v831_v35 = vpop.eup %830 }
 0x12d   :  { %134 = vrot.lane.b32.xlu1 %v831_v35, %s932_s2 }
 0x180   :  { %v192_v58 = vpop.permute.xlu2 %191 }
 0x19f   :  { %v135_v37 = vpop.permute.xlu1 %134 }
 0x1a0   :  { %v137_v38 = vmul.f32 %v135_v37, %v118_v29 }
 0x1a2   :  { %140 = vrot.lane.b32.xlu1 %v137_v38, %s933_s24 }
 0x214   :  { %v141_v41 = vpop.permute.xlu1 %140 }
 0x215   :  { %801 = vmatmul.msk.f32.vlgmr.msrb.gmra.mxu0 %vm44_vm0, %v141_v41 }
 0x292   :  { %v161_v43 = vpop.f32.mrf.mxu0 }
 0x293   :  { %v164_v44 = vadd.f32 %v161_v43, %v138_v42 }
 0x295   :  { %v802_v45 = vmul.f32 -1.442695, %v164_v44  ;;  %832 = vtanh.f32 %v164_v44 }
 0x297   :  { %834 = vpow2.f32 %v802_v45 }
 0x29b   :  { %v833_v46 = vpop.eup %832 }
 0x29c   :  { %186 = vrot.lane.b32.xlu2 %v833_v46, %s931_s23 }
 0x29d   :  { %v835_v47 = vpop.eup %834 }
 0x29e   :  { %v168_v48 = vadd.f32 1.0, %v835_v47 }
 0x2a0   :  { %836 = vrcp.f32 %v168_v48  ;;  %v180_v52 = vand.u32 2147483648, %v168_v48  ;;  %v178_v54 = vand.u32 2147483647, %v168_v48  ;;  %vm174_vm6 = vweird.f32 %v168_v48 }
 0x2a2   :  { %v181_v56 = vor.u32 1.1754944e-38, %v180_v52  ;;  %vm179_vm8 = vcmp.eq.f32.partialorder %v178_v54, 8.507059e+37 }
 0x2a6   :  { %v837_v49 = vpop.eup %836 }
 0x2a7   :  { %v170_v50 = vmul.f32 %v837_v49, %v168_v48  ;;  %vm175_vm5 = vweird.f32 %v837_v49 }
 0x2a8   :  { %vm176_vm7 = vmor %vm174_vm6, %vm175_vm5 }
 0x2a9   :  { %v171_v51 = vsub.f32 1.0, %v170_v50 }
 0x2ab   :  { %v172_v53 = vmul.f32 %v837_v49, %v171_v51 }
 0x2ad   :  { %v173_v55 = vadd.f32 %v837_v49, %v172_v53 }
 0x2af   :  { %v177_v57 = vsel %vm176_vm7, %v837_v49, %v173_v55 }
 0x2b0   :  { %v182_v59 = vsel %vm179_vm8, %v181_v56, %v177_v57 }
 0x2b1   :  { %v194_v60 = vmul.f32 %v192_v58, %v182_v59 }
 0x2b3   :  { %196 = vrot.lane.b32.xlu0 %v194_v60, %s932_s2 }
 0x2f6   :  { %v187_v61 = vpop.permute.xlu2 %186 }
 0x2f7   :  { %v189_v62 = vmul.f32 %v187_v61, %v182_v59 }
 0x325   :  { %v197_v63 = vpop.permute.xlu0 %196 }
 0x326   :  { %v199_v0 = vadd.f32 %v197_v63, %v189_v62 }
 0x328   :  { %838 = vtanh.f32 %v199_v0  ;;  %259 = vrot.lane.b32.xlu0 %v199_v0, %s933_s24 }
 0x32e   :  { %v839_v1 = vpop.eup %838 }
 0x32f   :  { %202 = vrot.lane.b32.xlu1 %v839_v1, %s932_s2 }
 0x39a   :  { %v260_v25 = vpop.permute.xlu0 %259 }
 0x3a1   :  { %v203_v3 = vpop.permute.xlu1 %202 }
 0x3a2   :  { %v205_v6 = vmul.f32 %v203_v3, %v182_v59  ;;  %v342_v59 = vld [vmem:[#allocation2 + $0x8] sm:$0x3] }
 0x3a4   :  { %208 = vrot.lane.b32.xlu2 %v205_v6, %s933_s24 }
 0x3fe   :  { %v209_v7 = vpop.permute.xlu2 %208 }
 0x3ff   :  { %803 = vmatmul.msk.f32.vlgmr.msra.gmra.mxu3 %vm44_vm0, %v209_v7 }
 0x482   :  { %v229_v10 = vpop.f32.mrf.mxu3 }
 0x483   :  { %v232_v11 = vadd.f32 %v229_v10, %v206_v9 }
 0x485   :  { %v804_v12 = vmul.f32 -1.442695, %v232_v11  ;;  %840 = vtanh.f32 %v232_v11 }
 0x487   :  { %842 = vpow2.f32 %v804_v12 }
 0x48b   :  { %v841_v13 = vpop.eup %840 }
 0x48c   :  { %254 = vrot.lane.b32.xlu1 %v841_v13, %s931_s23 }
 0x48d   :  { %v843_v14 = vpop.eup %842 }
 0x48e   :  { %v236_v15 = vadd.f32 1.0, %v843_v14 }
 0x490   :  { %844 = vrcp.f32 %v236_v15  ;;  %v248_v19 = vand.u32 2147483648, %v236_v15  ;;  %v246_v21 = vand.u32 2147483647, %v236_v15  ;;  %vm242_vm10 = vweird.f32 %v236_v15 }
 0x492   :  { %v249_v23 = vor.u32 1.1754944e-38, %v248_v19  ;;  %vm247_vm12 = vcmp.eq.f32.partialorder %v246_v21, 8.507059e+37 }
 0x496   :  { %v845_v16 = vpop.eup %844 }
 0x497   :  { %v238_v17 = vmul.f32 %v845_v16, %v236_v15  ;;  %vm243_vm9 = vweird.f32 %v845_v16 }
 0x498   :  { %vm244_vm11 = vmor %vm242_vm10, %vm243_vm9 }
 0x499   :  { %v239_v18 = vsub.f32 1.0, %v238_v17 }
 0x49b   :  { %v240_v20 = vmul.f32 %v845_v16, %v239_v18 }
 0x49d   :  { %v241_v22 = vadd.f32 %v845_v16, %v240_v20 }
 0x49f   :  { %v245_v24 = vsel %vm244_vm11, %v845_v16, %v241_v22 }
 0x4a0   :  { %v250_v26 = vsel %vm247_vm12, %v249_v23, %v245_v24 }
 0x4a1   :  { %v262_v27 = vmul.f32 %v260_v25, %v250_v26 }
 0x4a3   :  { %264 = vrot.lane.b32.xlu2 %v262_v27, %s932_s2 }
 0x4fd   :  { %v265_v30 = vpop.permute.xlu2 %264 }
 0x4fe   :  { %v255_v28 = vpop.permute.xlu1 %254 }
 0x4ff   :  { %v257_v29 = vmul.f32 %v255_v28, %v250_v26 }
 0x501   :  { %v267_v31 = vadd.f32 %v265_v30, %v257_v29 }
 0x503   :  { %846 = vtanh.f32 %v267_v31  ;;  %327 = vrot.lane.b32.xlu2 %v267_v31, %s933_s24 }
 0x509   :  { %v847_v32 = vpop.eup %846 }
 0x50a   :  { %270 = vrot.lane.b32.xlu0 %v847_v32, %s932_s2 }
 0x55d   :  { %v328_v48 = vpop.permute.xlu2 %327 }
 0x57c   :  { %v271_v33 = vpop.permute.xlu0 %270 }
 0x57d   :  { %v273_v34 = vmul.f32 %v271_v33, %v250_v26  ;;  %v410_v26 = vld [vmem:[#allocation2 + $0xa] sm:$0x3] }
 0x57f   :  { %276 = vrot.lane.b32.xlu1 %v273_v34, %s933_s24 }
 0x5f1   :  { %v277_v35 = vpop.permute.xlu1 %276 }
 0x5f2   :  { %805 = vmatmul.msk.f32.vlgmr.msrb.gmra.mxu1 %vm44_vm0, %v277_v35 }
 0x5f3   :  { %564 = vmatpush.msrb.mxu1 %v989_v2 }
 0x5f5   :  { %565 = vmatpush.msrb.mxu1 %v998_v4 }
 0x5f7   :  { %566 = vmatpush.msrb.mxu1 %v1004_v5 }
 0x5f9   :  { %567 = vmatpush.msrb.mxu1 %v1017_v8 }
 0x66f   :  { %v297_v37 = vpop.f32.mrf.mxu1 }
 0x670   :  { %v300_v38 = vadd.f32 %v297_v37, %v274_v36 }
 0x672   :  { %v806_v39 = vmul.f32 -1.442695, %v300_v38  ;;  %848 = vtanh.f32 %v300_v38 }
 0x674   :  { %850 = vpow2.f32 %v806_v39 }
 0x678   :  { %v849_v40 = vpop.eup %848 }
 0x679   :  { %322 = vrot.lane.b32.xlu0 %v849_v40, %s931_s23 }
 0x67a   :  { %v851_v41 = vpop.eup %850 }
 0x67b   :  { %v304_v42 = vadd.f32 1.0, %v851_v41 }
 0x67d   :  { %852 = vrcp.f32 %v304_v42  ;;  %v316_v4 = vand.u32 2147483648, %v304_v42  ;;  %v314_v5 = vand.u32 2147483647, %v304_v42  ;;  %vm310_vm14 = vweird.f32 %v304_v42 }
 0x67f   :  { %v317_v46 = vor.u32 1.1754944e-38, %v316_v4  ;;  %vm315_vm1 = vcmp.eq.f32.partialorder %v314_v5, 8.507059e+37 }
 0x683   :  { %v853_v43 = vpop.eup %852 }
 0x684   :  { %v306_v2 = vmul.f32 %v853_v43, %v304_v42  ;;  %vm311_vm13 = vweird.f32 %v853_v43 }
 0x685   :  { %vm312_vm15 = vmor %vm310_vm14, %vm311_vm13 }
 0x686   :  { %v307_v44 = vsub.f32 1.0, %v306_v2 }
 0x688   :  { %v308_v45 = vmul.f32 %v853_v43, %v307_v44 }
 0x68a   :  { %v309_v8 = vadd.f32 %v853_v43, %v308_v45 }
 0x68c   :  { %v313_v47 = vsel %vm312_vm15, %v853_v43, %v309_v8 }
 0x68d   :  { %v318_v49 = vsel %vm315_vm1, %v317_v46, %v313_v47 }
 0x68e   :  { %v330_v50 = vmul.f32 %v328_v48, %v318_v49 }
 0x690   :  { %332 = vrot.lane.b32.xlu1 %v330_v50, %s932_s2 }
 0x6eb   :  { %v323_v51 = vpop.permute.xlu0 %322 }
 0x6ec   :  { %v325_v52 = vmul.f32 %v323_v51, %v318_v49 }
 0x702   :  { %v333_v53 = vpop.permute.xlu1 %332 }
 0x703   :  { %v335_v54 = vadd.f32 %v333_v53, %v325_v52 }
 0x705   :  { %854 = vtanh.f32 %v335_v54  ;;  %395 = vrot.lane.b32.xlu1 %v335_v54, %s933_s24 }
 0x70b   :  { %v855_v55 = vpop.eup %854 }
 0x70c   :  { %338 = vrot.lane.b32.xlu2 %v855_v55, %s932_s2 }
 0x766   :  { %v339_v56 = vpop.permute.xlu2 %338 }
 0x767   :  { %v341_v57 = vmul.f32 %v339_v56, %v318_v49  ;;  %v478_v49 = vld [vmem:[#allocation2 + $0xc] sm:$0x3] }
 0x769   :  { %344 = vrot.lane.b32.xlu0 %v341_v57, %s933_s24 }
 0x777   :  { %v396_v15 = vpop.permute.xlu1 %395 }
 0x7db   :  { %v345_v58 = vpop.permute.xlu0 %344 }
 0x7dc   :  { %807 = vmatmul.msk.f32.vlgmr.msra.gmra.mxu1 %vm44_vm0, %v345_v58 }
 0x859   :  { %v365_v60 = vpop.f32.mrf.mxu1 }
 0x85a   :  { %v368_v61 = vadd.f32 %v365_v60, %v342_v59 }
 0x85c   :  { %v808_v62 = vmul.f32 -1.442695, %v368_v61  ;;  %856 = vtanh.f32 %v368_v61 }
 0x85e   :  { %858 = vpow2.f32 %v808_v62 }
 0x862   :  { %v857_v63 = vpop.eup %856 }
 0x863   :  { %390 = vrot.lane.b32.xlu2 %v857_v63, %s931_s23 }
 0x864   :  { %v859_v0 = vpop.eup %858 }
 0x865   :  { %v372_v1 = vadd.f32 1.0, %v859_v0 }
 0x867   :  { %860 = vrcp.f32 %v372_v1  ;;  %v384_v9 = vand.u32 2147483648, %v372_v1  ;;  %v382_v11 = vand.u32 2147483647, %v372_v1  ;;  %vm378_vm3 = vweird.f32 %v372_v1 }
 0x869   :  { %v385_v13 = vor.u32 1.1754944e-38, %v384_v9  ;;  %vm383_vm5 = vcmp.eq.f32.partialorder %v382_v11, 8.507059e+37 }
 0x86d   :  { %v861_v3 = vpop.eup %860 }
 0x86e   :  { %v374_v6 = vmul.f32 %v861_v3, %v372_v1  ;;  %vm379_vm2 = vweird.f32 %v861_v3 }
 0x86f   :  { %vm380_vm4 = vmor %vm378_vm3, %vm379_vm2 }
 0x870   :  { %v375_v7 = vsub.f32 1.0, %v374_v6 }
 0x872   :  { %v376_v10 = vmul.f32 %v861_v3, %v375_v7 }
 0x874   :  { %v377_v12 = vadd.f32 %v861_v3, %v376_v10 }
 0x876   :  { %v381_v14 = vsel %vm380_vm4, %v861_v3, %v377_v12 }
 0x877   :  { %v386_v16 = vsel %vm383_vm5, %v385_v13, %v381_v14 }
 0x878   :  { %v398_v17 = vmul.f32 %v396_v15, %v386_v16  ;;  %v546_v15 = vld [vmem:[#allocation2 + $0xe] sm:$0x3] }
 0x87a   :  { %400 = vrot.lane.b32.xlu0 %v398_v17, %s932_s2 }
 0x8bd   :  { %v391_v18 = vpop.permute.xlu2 %390 }
 0x8be   :  { %v393_v19 = vmul.f32 %v391_v18, %v386_v16  ;;  %v815_v18 = vmul.f32 -1.442695, %v546_v15 }
 0x8ec   :  { %v401_v20 = vpop.permute.xlu0 %400 }
 0x8ed   :  { %v403_v21 = vadd.f32 %v401_v20, %v393_v19 }
 0x8ef   :  { %862 = vtanh.f32 %v403_v21  ;;  %463 = vrot.lane.b32.xlu0 %v403_v21, %s933_s24 }
 0x8f5   :  { %v863_v22 = vpop.eup %862 }
 0x8f6   :  { %406 = vrot.lane.b32.xlu1 %v863_v22, %s932_s2 }
 0x961   :  { %v464_v42 = vpop.permute.xlu0 %463 }
 0x968   :  { %v407_v23 = vpop.permute.xlu1 %406 }
 0x969   :  { %v409_v24 = vmul.f32 %v407_v23, %v386_v16 }
 0x96b   :  { %412 = vrot.lane.b32.xlu2 %v409_v24, %s933_s24 }
 0x9c5   :  { %v413_v25 = vpop.permute.xlu2 %412 }
 0x9c6   :  { %809 = vmatmul.msk.f32.vlgmr.msrb.gmra.mxu3 %vm44_vm0, %v413_v25 }
 0xa49   :  { %v433_v27 = vpop.f32.mrf.mxu3 }
 0xa4a   :  { %v436_v28 = vadd.f32 %v433_v27, %v410_v26 }
 0xa4c   :  { %v810_v29 = vmul.f32 -1.442695, %v436_v28  ;;  %864 = vtanh.f32 %v436_v28 }
 0xa4e   :  { %866 = vpow2.f32 %v810_v29 }
 0xa52   :  { %v865_v30 = vpop.eup %864 }
 0xa53   :  { %458 = vrot.lane.b32.xlu1 %v865_v30, %s931_s23 }
 0xa54   :  { %v867_v31 = vpop.eup %866 }
 0xa55   :  { %v440_v32 = vadd.f32 1.0, %v867_v31 }
 0xa57   :  { %868 = vrcp.f32 %v440_v32  ;;  %v452_v36 = vand.u32 2147483648, %v440_v32  ;;  %v450_v38 = vand.u32 2147483647, %v440_v32  ;;  %vm446_vm7 = vweird.f32 %v440_v32 }
 0xa59   :  { %v453_v40 = vor.u32 1.1754944e-38, %v452_v36  ;;  %vm451_vm9 = vcmp.eq.f32.partialorder %v450_v38, 8.507059e+37 }
 0xa5d   :  { %v869_v33 = vpop.eup %868 }
 0xa5e   :  { %v442_v34 = vmul.f32 %v869_v33, %v440_v32  ;;  %vm447_vm6 = vweird.f32 %v869_v33 }
 0xa5f   :  { %vm448_vm8 = vmor %vm446_vm7, %vm447_vm6  ;;  %vm659_vm7 = vcmask 253952  }
 0xa60   :  { %v443_v35 = vsub.f32 1.0, %v442_v34 }
 0xa62   :  { %v444_v37 = vmul.f32 %v869_v33, %v443_v35 }
 0xa64   :  { %v445_v39 = vadd.f32 %v869_v33, %v444_v37 }
 0xa66   :  { %v449_v41 = vsel %vm448_vm8, %v869_v33, %v445_v39  ;;  %vm665_vm8 = vcmask 516352  }
 0xa67   :  { %v454_v43 = vsel %vm451_vm9, %v453_v40, %v449_v41  ;;  %vm673_vm9 = vcmask 778752  }
 0xa68   :  { %v466_v2 = vmul.f32 %v464_v42, %v454_v43 }
 0xa6a   :  { %468 = vrot.lane.b32.xlu2 %v466_v2, %s932_s2 }
 0xac4   :  { %v469_v45 = vpop.permute.xlu2 %468 }
 0xac5   :  { %v459_v44 = vpop.permute.xlu1 %458 }
 0xac6   :  { %v461_v4 = vmul.f32 %v459_v44, %v454_v43 }
 0xac8   :  { %v471_v5 = vadd.f32 %v469_v45, %v461_v4 }
 0xaca   :  { %870 = vtanh.f32 %v471_v5  ;;  %531 = vrot.lane.b32.xlu2 %v471_v5, %s933_s24 }
 0xad0   :  { %v871_v8 = vpop.eup %870 }
 0xad1   :  { %474 = vrot.lane.b32.xlu0 %v871_v8, %s932_s2 }
 0xb24   :  { %v532_v1 = vpop.permute.xlu2 %531 }
 0xb43   :  { %v475_v46 = vpop.permute.xlu0 %474 }
 0xb44   :  { %v477_v47 = vmul.f32 %v475_v46, %v454_v43 }
 0xb46   :  { %480 = vrot.lane.b32.xlu1 %v477_v47, %s933_s24 }
 0xbb8   :  { %v481_v48 = vpop.permute.xlu1 %480 }
 0xbb9   :  { %811 = vmatmul.msk.f32.vlgmr.msra.gmra.mxu0 %vm44_vm0, %v481_v48 }
 0xc36   :  { %v501_v50 = vpop.f32.mrf.mxu0 }
 0xc37   :  { %v504_v51 = vadd.f32 %v501_v50, %v478_v49 }
 0xc39   :  { %v812_v52 = vmul.f32 -1.442695, %v504_v51  ;;  %872 = vtanh.f32 %v504_v51 }
 0xc3b   :  { %874 = vpow2.f32 %v812_v52 }
 0xc3f   :  { %v873_v53 = vpop.eup %872 }
 0xc40   :  { %526 = vrot.lane.b32.xlu0 %v873_v53, %s931_s23 }
 0xc41   :  { %v875_v54 = vpop.eup %874 }
 0xc42   :  { %v508_v55 = vadd.f32 1.0, %v875_v54 }
 0xc44   :  { %876 = vrcp.f32 %v508_v55  ;;  %v520_v59 = vand.u32 2147483648, %v508_v55  ;;  %v518_v61 = vand.u32 2147483647, %v508_v55  ;;  %vm514_vm11 = vweird.f32 %v508_v55 }
 0xc46   :  { %v521_v63 = vor.u32 1.1754944e-38, %v520_v59  ;;  %vm519_vm13 = vcmp.eq.f32.partialorder %v518_v61, 8.507059e+37 }
 0xc4a   :  { %v877_v56 = vpop.eup %876 }
 0xc4b   :  { %v510_v57 = vmul.f32 %v877_v56, %v508_v55  ;;  %vm515_vm10 = vweird.f32 %v877_v56 }
 0xc4c   :  { %vm516_vm12 = vmor %vm514_vm11, %vm515_vm10  ;;  %vm681_vm10 = vcmask 1041152  }
 0xc4d   :  { %v511_v58 = vsub.f32 1.0, %v510_v57 }
 0xc4f   :  { %v512_v60 = vmul.f32 %v877_v56, %v511_v58 }
 0xc51   :  { %v513_v62 = vadd.f32 %v877_v56, %v512_v60 }
 0xc53   :  { %v517_v0 = vsel %vm516_vm12, %v877_v56, %v513_v62 }
 0xc54   :  { %v522_v3 = vsel %vm519_vm13, %v521_v63, %v517_v0 }
 0xc55   :  { %v534_v6 = vmul.f32 %v532_v1, %v522_v3 }
 0xc57   :  { %536 = vrot.lane.b32.xlu1 %v534_v6, %s932_s2 }
 0xcb2   :  { %v527_v7 = vpop.permute.xlu0 %526 }
 0xcb3   :  { %v529_v9 = vmul.f32 %v527_v7, %v522_v3  ;;  %v699_v7 = vld [vmem:[%s1183_s4 + $0x78] sm:$0xff] }
 0xcb4   :  { %701 = vmatpush.msra.mxu2 %v699_v7 }
 0xcc9   :  { %v537_v10 = vpop.permute.xlu1 %536 }
 0xcca   :  { %v539_v11 = vadd.f32 %v537_v10, %v529_v9  ;;  %v698_v9 = vld [vmem:[%s1183_s4 + $0x70] sm:$0xff]  ;;  %v697_v10 = vld [vmem:[%s1183_s4 + $0x68] sm:$0xff] }
 0xccb   :  { %702 = vmatpush.msra.mxu2 %v698_v9 }
 0xccc   :  { %878 = vtanh.f32 %v539_v11  ;;  %599 = vrot.lane.b32.xlu1 %v539_v11, %s933_s24  ;;  %v696_v11 = vld [vmem:[%s1183_s4 + $0x60] sm:$0xff] }
 0xccd   :  { %880 = vtanh.f32 %v546_v15  ;;  %703 = vmatpush.msra.mxu2 %v697_v10 }
 0xcce   :  { %882 = vpow2.f32 %v815_v18  ;;  %v689_v18 = vld [vmem:[%s1183_s4 + $0x28] sm:$0xff] }
 0xccf   :  { %704 = vmatpush.msra.mxu2 %v696_v11 }
 0xcd2   :  { %v879_v12 = vpop.eup %878 }
 0xcd3   :  { %542 = vrot.lane.b32.xlu2 %v879_v12, %s932_s2  ;;  %v881_v16 = vpop.eup %880  ;;  %v695_v12 = vld [vmem:[%s1183_s4 + $0x58] sm:$0xff] }
 0xcd4   :  { %v883_v19 = vpop.eup %882  ;;  %705 = vmatpush.msra.mxu2 %v695_v12 }
 0xcd5   :  { %v617_v20 = vadd.f32 1.0, %v883_v19  ;;  %v688_v19 = vld [vmem:[%s1183_s4 + $0x20] sm:$0xff] }
 0xcd7   :  { %884 = vrcp.f32 %v617_v20  ;;  %vm623_vm14 = vweird.f32 %v617_v20  ;;  %v629_v28 = vand.u32 2147483648, %v617_v20  ;;  %v627_v30 = vand.u32 2147483647, %v617_v20 }
 0xcd9   :  { %v630_v32 = vor.u32 1.1754944e-38, %v629_v28  ;;  %vm628_vm2 = vcmp.eq.f32.partialorder %v627_v30, 8.507059e+37  ;;  %v743_v28 = vld [vmem:[%s1185_s6 + $0x18] sm:$0xff]  ;;  %v741_v30 = vld [vmem:[%s1185_s6 + $0x8] sm:$0xff] }
 0xcda   :  { %760 = vmatpush.msra.mxu3 %v743_v28 }
 0xcdd   :  { %v885_v21 = vpop.eup %884 }
 0xcde   :  { %v619_v22 = vmul.f32 %v885_v21, %v617_v20  ;;  %vm624_vm15 = vweird.f32 %v885_v21  ;;  %v687_v20 = vld [vmem:[%s1183_s4 + $0x18] sm:$0xff] }
 0xcdf   :  { %vm625_vm1 = vmor %vm623_vm14, %vm624_vm15  ;;  %vm768_vm15 = vcmask 32768  }
 0xce0   :  { %v620_v23 = vsub.f32 1.0, %v619_v22  ;;  %v685_v22 = vld [vmem:[%s1183_s4 + $0x8] sm:$0xff] }
 0xce2   :  { %v621_v26 = vmul.f32 %v885_v21, %v620_v23 }
 0xce4   :  { %v622_v29 = vadd.f32 %v885_v21, %v621_v26 }
 0xce6   :  { %v626_v33 = vsel %vm625_vm1, %v885_v21, %v622_v29  ;;  %v686_v21 = vld [vmem:[%s1183_s4 + $0x10] sm:$0xff] }
 0xce7   :  { %v631_v36 = vsel %vm628_vm2, %v630_v32, %v626_v33  ;;  %v742_v29 = vld [vmem:[%s1185_s6 + $0x10] sm:$0xff]  ;;  %v700_v32 = vld [vmem:[%s1184_s5] sm:$0x1] }
 0xce8   :  { %v639_v37 = vmul.f32 0.0, %v631_v36  ;;  %761 = vmatpush.msra.mxu3 %v742_v29 }
 0xcea   :  { %762 = vmatpush.msra.mxu3 %v741_v30 }
 0xd2d   :  { %v543_v13 = vpop.permute.xlu2 %542 }
 0xd2e   :  { %v545_v14 = vmul.f32 %v543_v13, %v522_v3  ;;  %v694_v13 = vld [vmem:[%s1183_s4 + $0x50] sm:$0xff] }
 0xd2f   :  { %706 = vmatpush.msra.mxu2 %v694_v13 }
 0xd30   :  { %548 = vrot.lane.b32.xlu0 %v545_v14, %s933_s24  ;;  %v693_v14 = vld [vmem:[%s1183_s4 + $0x48] sm:$0xff] }
 0xd31   :  { %707 = vmatpush.msra.mxu2 %v693_v14 }
 0xd38   :  { %635 = vrot.lane.b32.xlu0 %v881_v16, %s931_s23  ;;  %v691_v16 = vld [vmem:[%s1183_s4 + $0x38] sm:$0xff] }
 0xd3e   :  { %v600_v45 = vpop.permute.xlu1 %599 }
 0xda2   :  { %v549_v17 = vpop.permute.xlu0 %548 }
 0xda3   :  { %813 = vmatmul.msk.f32.vlgmr.msrb.gmra.mxu1 %vm44_vm0, %v549_v17  ;;  %v690_v17 = vld [vmem:[%s1183_s4 + $0x30] sm:$0xff] }
 0xdaa   :  { %v636_v47 = vpop.permute.xlu0 %635 }
 0xdab   :  { %v638_v48 = vmul.f32 %v636_v47, %v631_v36 }
 0xe20   :  { %v569_v24 = vpop.f32.mrf.mxu1 }
 0xe21   :  { %v572_v25 = vadd.f32 %v569_v24, %v546_v15  ;;  %v692_v15 = vld [vmem:[%s1183_s4 + $0x40] sm:$0xff] }
 0xe22   :  { %708 = vmatpush.msra.mxu2 %v692_v15  ;;  %v684_v24 = vld [vmem:[%s1183_s4] sm:$0xff] }
 0xe23   :  { %v814_v27 = vmul.f32 -1.442695, %v572_v25  ;;  %886 = vtanh.f32 %v572_v25 }
 0xe24   :  { %709 = vmatpush.msra.mxu2 %v691_v16 }
 0xe25   :  { %888 = vpow2.f32 %v814_v27 }
 0xe26   :  { %710 = vmatpush.msra.mxu2 %v690_v17 }
 0xe28   :  { %711 = vmatpush.msra.mxu2 %v689_v18 }
 0xe29   :  { %v887_v31 = vpop.eup %886 }
 0xe2a   :  { %594 = vrot.lane.b32.xlu2 %v887_v31, %s931_s23  ;;  %712 = vmatpush.msra.mxu2 %v688_v19  ;;  %v740_v31 = vld [vmem:[%s1185_s6] sm:$0xff] }
 0xe2b   :  { %v889_v34 = vpop.eup %888  ;;  %763 = vmatpush.msra.mxu3 %v740_v31 }
 0xe2c   :  { %v576_v35 = vadd.f32 1.0, %v889_v34  ;;  %713 = vmatpush.msra.mxu2 %v687_v20 }
 0xe2e   :  { %890 = vrcp.f32 %v576_v35  ;;  %v588_v41 = vand.u32 2147483648, %v576_v35  ;;  %v586_v43 = vand.u32 2147483647, %v576_v35  ;;  %vm582_vm4 = vweird.f32 %v576_v35  ;;  %714 = vmatpush.msra.mxu2 %v686_v21 }
 0xe30   :  { %v589_v44 = vor.u32 1.1754944e-38, %v588_v41  ;;  %vm587_vm6 = vcmp.eq.f32.partialorder %v586_v43, 8.507059e+37  ;;  %715 = vmatpush.msra.mxu2 %v685_v22 }
 0xe32   :  { %641 = vrot.lane.b32.xlu2 %v639_v37, %s932_s2  ;;  %716 = vmatpush.msra.mxu2 %v684_v24 }
 0xe34   :  { %v891_v38 = vpop.eup %890 }
 0xe35   :  { %v578_v39 = vmul.f32 %v891_v38, %v576_v35  ;;  %vm583_vm3 = vweird.f32 %v891_v38 }
 0xe36   :  { %vm584_vm5 = vmor %vm582_vm4, %vm583_vm3 }
 0xe37   :  { %v579_v40 = vsub.f32 1.0, %v578_v39 }
 0xe39   :  { %v580_v42 = vmul.f32 %v891_v38, %v579_v40 }
 0xe3b   :  { %v581_v2 = vadd.f32 %v891_v38, %v580_v42 }
 0xe3d   :  { %v585_v4 = vsel %vm584_vm5, %v891_v38, %v581_v2 }
 0xe3e   :  { %v590_v5 = vsel %vm587_vm6, %v589_v44, %v585_v4 }
 0xe3f   :  { %v602_v8 = vmul.f32 %v600_v45, %v590_v5 }
 0xe41   :  { %604 = vrot.lane.b32.xlu1 %v602_v8, %s932_s2 }
 0xe84   :  { %v595_v46 = vpop.permute.xlu2 %594 }
 0xe85   :  { %v597_v52 = vmul.f32 %v595_v46, %v590_v5 }
 0xe8c   :  { %v642_v49 = vpop.permute.xlu2 %641 }
 0xe8d   :  { %v644_v50 = vadd.f32 %v642_v49, %v638_v48 }
 0xe8f   :  { %892 = vtanh.f32 %v644_v50 }
 0xe95   :  { %v893_v51 = vpop.eup %892 }
 0xe96   :  { %647 = vrot.lane.b32.xlu1 %v893_v51, %s932_s2 }
 0xeb3   :  { %v605_v53 = vpop.permute.xlu1 %604 }
 0xeb4   :  { %v607_v54 = vadd.f32 %v605_v53, %v597_v52 }
 0xeb6   :  { %894 = vtanh.f32 %v607_v54 }
 0xebc   :  { %v895_v55 = vpop.eup %894 }
 0xebd   :  { %610 = vrot.lane.b32.xlu0 %v895_v55, %s932_s2 }
 0xf08   :  { %v648_v56 = vpop.permute.xlu1 %647 }
 0xf09   :  { %v650_v57 = vmul.f32 %v648_v56, %v631_v36 }
 0xf0b   :  { %v662_v58 = vrot.slane %v650_v57, 1 }
 0xf0d   :  { %v664_v59 = vmul.f32 %v662_v58, %v650_v57  ;;  %v675_v60 = vsub.f32 %v650_v57, %v662_v58 }
 0xf0f   :  { %v676_v61 = vand.u32 2147483647, %v675_v60 }
 0xf11   :  { %678 = vrot.lane.b32.xlu1 %v676_v61, %s931_s23 }
 0xf2f   :  { %v611_v62 = vpop.permute.xlu0 %610 }
 0xf30   :  { %v613_v63 = vmul.f32 %v611_v62, %v590_v5  ;;  %v744_v5 = vld [vmem:[%s1186_s7] sm:$0x1] }
 0xf32   :  { %v652_v0 = vrot.slane %v613_v63, 1 }
 0xf34   :  { %v654_v1 = vmul.f32 %v652_v0, %v613_v63  ;;  %v667_v3 = vsub.f32 %v613_v63, %v652_v0 }
 0xf36   :  { %656 = vrot.lane.b32.xlu2 %v654_v1, %s933_s24  ;;  %v668_v6 = vand.u32 2147483647, %v667_v3 }
 0xf38   :  { %670 = vrot.lane.b32.xlu0 %v668_v6, %s932_s2 }
 0xf83   :  { %v679_v26 = vpop.permute.xlu1 %678 }
 0xf90   :  { %v657_v23 = vpop.permute.xlu2 %656 }
 0xf91   :  { %660 = vst.msk [vmem:[#allocation3] sm:$0x1] %vm659_vm7, %v657_v23 }
 0xf92   :  { %666 = vst.msk [vmem:[#allocation3] sm:$0x1] %vm665_vm8, %v664_v59 }
 0xfaa   :  { %v671_v25 = vpop.permute.xlu0 %670 }
 0xfab   :  { %674 = vst.msk [vmem:[#allocation3] sm:$0x1] %vm673_vm9, %v671_v25 }
 0xfac   :  { %682 = vst.msk [vmem:[#allocation3] sm:$0x1] %vm681_vm10, %v679_v26 }
 0xfb3   :  { %v683_v27 = vld [vmem:[#allocation3] sm:$0x1] }
 0xfb4   :  { %717 = vmatmul.f32.vlgmr.msra.gmra.mxu2 %v683_v27 }
0x1037   :  { %v718_v33 = vpop.f32.mrf.mxu2 }
0x1038   :  { %v719_v34 = vadd.f32 %v718_v33, %v700_v32 }
0x103a   :  { %v816_v35 = vmul.f32 -1.442695, %v719_v34 }
0x103c   :  { %896 = vpow2.f32 %v816_v35 }
0x1042   :  { %v897_v36 = vpop.eup %896 }
0x1043   :  { %v724_v37 = vadd.f32 1.0, %v897_v36 }
0x1045   :  { %898 = vrcp.f32 %v724_v37  ;;  %v736_v41 = vand.u32 2147483648, %v724_v37  ;;  %v734_v43 = vand.u32 2147483647, %v724_v37  ;;  %vm730_vm12 = vweird.f32 %v724_v37 }
0x1047   :  { %v737_v44 = vor.u32 1.1754944e-38, %v736_v41  ;;  %vm735_vm14 = vcmp.eq.f32.partialorder %v734_v43, 8.507059e+37 }
0x104b   :  { %v899_v38 = vpop.eup %898 }
0x104c   :  { %v726_v39 = vmul.f32 %v899_v38, %v724_v37  ;;  %vm731_vm11 = vweird.f32 %v899_v38 }
0x104d   :  { %vm732_vm13 = vmor %vm730_vm12, %vm731_vm11 }
0x104e   :  { %v727_v40 = vsub.f32 1.0, %v726_v39 }
0x1050   :  { %v728_v42 = vmul.f32 %v899_v38, %v727_v40 }
0x1052   :  { %v729_v2 = vadd.f32 %v899_v38, %v728_v42 }
0x1054   :  { %v733_v4 = vsel %vm732_vm13, %v899_v38, %v729_v2 }
0x1055   :  { %v738_v45 = vsel %vm735_vm14, %v737_v44, %v733_v4 }
0x1056   :  { %817 = vmatmul.msk.f32.vlgmr.msra.gmra.mxu3 %vm44_vm0, %v738_v45 }
0x10d9   :  { %v765_v8 = vpop.f32.mrf.mxu3 }
0x10da   :  { %v766_v46 = vadd.f32 %v765_v8, %v744_v5 }
0x10dc   :  { %v769_v47 = vsel %vm768_vm15, %v766_v46, -inf }
0x10dd   :  { %770 = vmax.xlane.f32.xlu2 %v769_v47 }
0x1150   :  { %v771_v48 = vpop.xlane.xlu2 %770 }
0x1151   :  { %v772_v49 = vsub.f32 %v766_v46, %v771_v48 }
0x1153   :  { %v773_v50 = vmul.f32 1.442695, %v772_v49 }
0x1155   :  { %900 = vpow2.f32 %v773_v50 }
0x115b   :  { %v901_v51 = vpop.eup %900 }
0x115c   :  { %v775_v52 = vsel %vm768_vm15, %v901_v51, 0.0 }
0x115d   :  { %776 = vadd.xlane.f32.xlu0 %v775_v52 }
0x11d0   :  { %v777_v53 = vpop.xlane.xlu0 %776 }
0x11d1   :  { %902 = vlog2.f32 %v777_v53 }
0x11d7   :  { %v903_v54 = vpop.eup %902 }
0x11d8   :  { %v779_v55 = vmul.f32 0.6931472, %v903_v54 }
0x11da   :  { %v780_v56 = vsub.f32 %v772_v49, %v779_v55 }
0x11dc   :  { %781 = vst.msk [vmem:[#allocation4] sm:$0x1] %vm768_vm15, %v780_v56 }
0x11dd   :  { %792 = dma.vmem_to_hbm [thread:$0]  %s788_s20, 16, %s790_s22, [#allocation5]  }
0x11de   :  { %928 = dma.done.wait [#allocation5], 16  }
0x11df   :  { %929 = vsyncadd [#allocation5], 4294967280 }
0x11e0   :  { %797 = vsyncpa [#allocation5], 1 }

</bundles_post_ra>
